<compile_context>
chip_gen: v7x
topology: tpu7x:2x2x1
jax: 0.10.0
libtpu: 0.0.40
codegen_flags: <defaults>
</compile_context>

<pallas_src>
import functools

import jax
import jax.numpy as jnp
from jax.experimental import pallas as pl
from jax.experimental.pallas import tpu as pltpu


def _round_up(v: int, m: int) -> int:
    return (v + m - 1) // m * m


def _vmem_capacity_bytes() -> int:
    """Per-TensorCore VMEM capacity; conservative fallback = v7x (64 MiB)."""
    try:
        return int(pltpu.get_tpu_info().vmem_capacity_bytes)
    except Exception:
        return 64 << 20


# ------------------------------ kernels -------------------------------------

def ffn_resident_kernel(x_ref, w1_ref, b1_ref, w2_ref, b2_ref, o_ref):
    """Both weight matrices VMEM-resident; 1-D grid over token tiles."""
    # MXU operands in param dtype (bf16 by default); f32 accumulation.
    x = x_ref[...].astype(w1_ref.dtype)
    h = jnp.dot(x, w1_ref[...], preferred_element_type=jnp.float32)
    # Bias + ReLU ride in VPU slots (f32).
    h = jnp.maximum(h + b1_ref[...].astype(jnp.float32), 0.0)
    out = jnp.dot(h.astype(w2_ref.dtype), w2_ref[...],
                  preferred_element_type=jnp.float32)
    o_ref[...] = (out + b2_ref[...].astype(jnp.float32)).astype(o_ref.dtype)


def ffn_streamed_kernel(x_ref, w1_ref, b1_ref, w2_ref, b2_ref, o_ref, acc_ref):
    """Hidden-axis streamed path: per step consume w1[:, h_tile], w2[h_tile, :],
    accumulate the fc_2 partial product in an f32 scratch accumulator."""
    hi = pl.program_id(1)

    @pl.when(hi == 0)
    def _init():
        acc_ref[...] = jnp.zeros_like(acc_ref)

    x = x_ref[...].astype(w1_ref.dtype)
    h = jnp.dot(x, w1_ref[...], preferred_element_type=jnp.float32)
    h = jnp.maximum(h + b1_ref[...].astype(jnp.float32), 0.0)   # per-tile ReLU is exact
    acc_ref[...] += jnp.dot(h.astype(w2_ref.dtype), w2_ref[...],
                            preferred_element_type=jnp.float32)

    @pl.when(hi == pl.num_programs(1) - 1)
    def _finalize():
        o_ref[...] = (acc_ref[...]
                      + b2_ref[...].astype(jnp.float32)).astype(o_ref.dtype)


# ------------------------------ wrapper --------------------------------------

@functools.partial(
    jax.jit,
    static_argnames=("tile_m_target", "tile_h_target", "param_dtype",
                     "stream_hidden"))
def positionwise_ffn(x, w1, b1, w2, b2, *,
                     tile_m_target=512, tile_h_target=512,
                     param_dtype=jnp.bfloat16, stream_hidden=None):
    """y = ReLU(x @ w1 + b1) @ w2 + b2  (BERT position-wise FFN).

    x : (batch, seq, d_model)
    w1: (d_model, hidden)   b1: (hidden,)
    w2: (hidden, d_model)   b2: (d_model,)   (pre-transposed vs. torch Linear)

    param_dtype: dtype of BOTH MXU operands (weights and the in-kernel
      activation cast).  Default bf16 (MXU-native); accumulation stays f32.
      Pass jnp.float32 (or None) for a full-precision path.
    stream_hidden: None = auto (stream weight slices over a hidden-axis grid
      when resident weights would not fit the device VMEM cap); True/False to
      force a path.
    """
    batch, seq, d_model = x.shape
    hidden = w1.shape[1]
    m = batch * seq

    if param_dtype is not None and w1.dtype != param_dtype:
        w1 = w1.astype(param_dtype)
        w2 = w2.astype(param_dtype)

    xb = x.dtype.itemsize
    wb = w1.dtype.itemsize

    # ---- Token tiling: multiple of the sublane pack for x's dtype. ----
    sub = {4: 8, 2: 16, 1: 32}.get(xb, 8)
    if m <= tile_m_target:
        tile_m = _round_up(max(m, sub), sub)
    else:
        tile_m = tile_m_target
    m_pad = _round_up(m, tile_m)

    # ---- Feature padding: lane-dense multiples of 128. ----
    d_model_p = _round_up(max(d_model, 128), 128)
    hidden_128 = _round_up(max(hidden, 128), 128)

    # ---- Device-aware VMEM cap and path selection. ----
    cap = max(min(_vmem_capacity_bytes() - (12 << 20), 100 << 20), 24 << 20)

    resident_bytes = (
        2 * tile_m * d_model_p * xb            # x tile (double-buffered)
        + 2 * tile_m * d_model_p * xb          # out tile
        + 2 * d_model_p * hidden_128 * wb      # w1 (default buffering)
        + 2 * hidden_128 * d_model_p * wb      # w2
        + 2 * (hidden_128 + d_model_p) * 4     # biases (f32)
        + tile_m * hidden_128 * (4 + wb)       # f32 h + its MXU-dtype cast
        + tile_m * d_model_p * (4 + wb)        # f32 out + x's MXU-dtype cast
    )

    if stream_hidden is None:
        stream_hidden = int(resident_bytes * 1.25) > cap

    if stream_hidden:
        tile_h = _round_up(min(tile_h_target, hidden_128), 128)
        hidden_p = _round_up(hidden, tile_h)
    else:
        tile_h = hidden_128
        hidden_p = hidden_128

    # ---- Pad operands only when actually unaligned (zero-padding is inert).
    x2d = x.reshape(m, d_model)
    if d_model_p != d_model:
        x2d = jnp.pad(x2d, ((0, 0), (0, d_model_p - d_model)))
    if m_pad != m:
        x2d = jnp.pad(x2d, ((0, m_pad - m), (0, 0)))
    if (d_model_p, hidden_p) != (d_model, hidden):
        w1 = jnp.pad(w1, ((0, d_model_p - d_model), (0, hidden_p - hidden)))
        w2 = jnp.pad(w2, ((0, hidden_p - hidden), (0, d_model_p - d_model)))
    b1p = (jnp.pad(b1, ((0, hidden_p - hidden),)) if hidden_p != hidden
           else b1).reshape(1, hidden_p)
    b2p = (jnp.pad(b2, ((0, d_model_p - d_model),)) if d_model_p != d_model
           else b2).reshape(1, d_model_p)

    flops = 4 * m_pad * d_model_p * hidden_p  # two matmuls, 2 flops per MAC
    bytes_accessed = (
        m_pad * d_model_p * xb * 2
        + 2 * d_model_p * hidden_p * wb
        + (hidden_p + d_model_p) * 4
    )
    cost = pl.CostEstimate(flops=flops, transcendentals=0,
                           bytes_accessed=bytes_accessed)

    if not stream_hidden:
        vmem_limit = int(min(max(int(resident_bytes * 1.25), 8 << 20), cap))
        out2d = pl.pallas_call(
            ffn_resident_kernel,
            out_shape=jax.ShapeDtypeStruct((m_pad, d_model_p), x.dtype),
            grid_spec=pltpu.PrefetchScalarGridSpec(
                num_scalar_prefetch=0,
                grid=(m_pad // tile_m,),
                in_specs=[
                    pl.BlockSpec((tile_m, d_model_p), lambda i: (i, 0)),
                    pl.BlockSpec((d_model_p, hidden_p), lambda i: (0, 0)),
                    pl.BlockSpec((1, hidden_p), lambda i: (0, 0)),
                    pl.BlockSpec((hidden_p, d_model_p), lambda i: (0, 0)),
                    pl.BlockSpec((1, d_model_p), lambda i: (0, 0)),
                ],
                out_specs=pl.BlockSpec((tile_m, d_model_p), lambda i: (i, 0)),
            ),
            compiler_params=pltpu.CompilerParams(
                dimension_semantics=("parallel",),
                vmem_limit_bytes=vmem_limit,
            ),
            cost_estimate=cost,
        )(x2d, w1, b1p, w2, b2p)
    else:
        streamed_bytes = (
            2 * tile_m * d_model_p * xb * 2     # x + out tiles
            + 2 * d_model_p * tile_h * wb       # w1 slice
            + 2 * tile_h * d_model_p * wb       # w2 slice
            + 2 * (tile_h + d_model_p) * 4      # bias slices
            + tile_m * d_model_p * 4            # f32 accumulator scratch
            + tile_m * tile_h * (4 + wb)        # f32 h + its MXU-dtype cast
            + tile_m * d_model_p * (4 + wb)     # x cast + f32 out
        )
        vmem_limit = int(min(max(int(streamed_bytes * 1.25), 8 << 20), cap))
        out2d = pl.pallas_call(
            ffn_streamed_kernel,
            out_shape=jax.ShapeDtypeStruct((m_pad, d_model_p), x.dtype),
            grid_spec=pltpu.PrefetchScalarGridSpec(
                num_scalar_prefetch=0,
                grid=(m_pad // tile_m, hidden_p // tile_h),
                in_specs=[
                    pl.BlockSpec((tile_m, d_model_p), lambda i, h: (i, 0)),
                    pl.BlockSpec((d_model_p, tile_h), lambda i, h: (0, h)),
                    pl.BlockSpec((1, tile_h), lambda i, h: (0, h)),
                    pl.BlockSpec((tile_h, d_model_p), lambda i, h: (h, 0)),
                    pl.BlockSpec((1, d_model_p), lambda i, h: (0, 0)),
                ],
                out_specs=pl.BlockSpec((tile_m, d_model_p), lambda i, h: (i, 0)),
                scratch_shapes=[pltpu.VMEM((tile_m, d_model_p), jnp.float32)],
            ),
            compiler_params=pltpu.CompilerParams(
                dimension_semantics=("parallel", "arbitrary"),
                vmem_limit_bytes=vmem_limit,
            ),
            cost_estimate=cost,
        )(x2d, w1, b1p, w2, b2p)

    if m_pad != m or d_model_p != d_model:
        out2d = out2d[:m, :d_model]
    return out2d.reshape(batch, seq, d_model)


if __name__ == "__main__":
    # Small shapes consistent with the module: batch=2, seq=8, d_model=32, hidden=64
    batch, seq, d_model, hidden = 2, 8, 32, 64

    key = jax.random.PRNGKey(0)
    kx, kw1, kb1, kw2, kb2 = jax.random.split(key, 5)

    x = jax.random.normal(kx, (batch, seq, d_model), dtype=jnp.float32)

    lim1 = 1.0 / (d_model ** 0.5)
    lim2 = 1.0 / (hidden ** 0.5)
    # Stored pre-transposed: w1 is (d_model, hidden), w2 is (hidden, d_model).
    w1 = jax.random.uniform(kw1, (d_model, hidden), jnp.float32, -lim1, lim1)
    b1 = jax.random.uniform(kb1, (hidden,), jnp.float32, -lim1, lim1)
    w2 = jax.random.uniform(kw2, (hidden, d_model), jnp.float32, -lim2, lim2)
    b2 = jax.random.uniform(kb2, (d_model,), jnp.float32, -lim2, lim2)

    ref = jnp.maximum(x @ w1 + b1, 0.0) @ w2 + b2

    # 1) f32 operands, resident-weight path: tight reference check.
    out_f32 = jax.block_until_ready(
        positionwise_ffn(x, w1, b1, w2, b2, param_dtype=jnp.float32))
    assert out_f32.shape == (batch, seq, d_model)
    assert jnp.allclose(out_f32, ref, atol=1e-5, rtol=1e-5)

    # 2) Default bf16 MXU-operand path (looser tolerance).
    out_bf16 = jax.block_until_ready(positionwise_ffn(x, w1, b1, w2, b2))
    assert out_bf16.shape == (batch, seq, d_model)
    assert jnp.allclose(out_bf16, ref, atol=5e-2, rtol=5e-2)

    # 3) Hidden-streamed path (forced), ragged hidden size, f32 operands.
    d2, h2 = 64, 320
    kx2, kw3, kb3, kw4, kb4 = jax.random.split(jax.random.PRNGKey(1), 5)
    x2 = jax.random.normal(kx2, (batch, seq, d2), dtype=jnp.float32)
    l3, l4 = 1.0 / (d2 ** 0.5), 1.0 / (h2 ** 0.5)
    w3 = jax.random.uniform(kw3, (d2, h2), jnp.float32, -l3, l3)
    b3 = jax.random.uniform(kb3, (h2,), jnp.float32, -l3, l3)
    w4 = jax.random.uniform(kw4, (h2, d2), jnp.float32, -l4, l4)
    b4 = jax.random.uniform(kb4, (d2,), jnp.float32, -l4, l4)
    ref2 = jnp.maximum(x2 @ w3 + b3, 0.0) @ w4 + b4
    out_stream = jax.block_until_ready(
        positionwise_ffn(x2, w3, b3, w4, b4, param_dtype=jnp.float32,
                         stream_hidden=True, tile_h_target=128))
    assert out_stream.shape == (batch, seq, d2)
    assert jnp.allclose(out_stream, ref2, atol=1e-4, rtol=1e-4)

    print("KERNEL_OK")
</pallas_src>

<mosaic_0001>
module attributes {stable_mosaic.version = 11 : i64} {
  func.func @ffn_resident_kernel(%arg0: i32, %arg1: memref<16x128xf32, #tpu.memory_space<vmem>>, %arg2: memref<128x128xf32, #tpu.memory_space<vmem>>, %arg3: memref<1x128xf32, #tpu.memory_space<vmem>>, %arg4: memref<128x128xf32, #tpu.memory_space<vmem>>, %arg5: memref<1x128xf32, #tpu.memory_space<vmem>>, %arg6: memref<16x128xf32, #tpu.memory_space<vmem>>) attributes {dimension_semantics = [#tpu.dimension_semantics<parallel>], iteration_bounds = array<i64: 1>, scalar_prefetch = 0 : i64, scratch_operands = 0 : i64, tpu.core_type = #tpu.core_type<tc>, window_params = [{transform_indices = @transform_0, window_bounds = array<i64: 16, 128>}, {pipeline_mode = #tpu.pipeline_mode<synchronous>, transform_indices = @transform_1, window_bounds = array<i64: 128, 128>}, {pipeline_mode = #tpu.pipeline_mode<synchronous>, transform_indices = @transform_2, window_bounds = array<i64: 1, 128>}, {pipeline_mode = #tpu.pipeline_mode<synchronous>, transform_indices = @transform_3, window_bounds = array<i64: 128, 128>}, {pipeline_mode = #tpu.pipeline_mode<synchronous>, transform_indices = @transform_4, window_bounds = array<i64: 1, 128>}, {transform_indices = @transform_5, window_bounds = array<i64: 16, 128>}]} {
    %c0 = arith.constant 0 : index
    %c0_0 = arith.constant 0 : index
    %0 = vector.load %arg1[%c0, %c0_0] : memref<16x128xf32, #tpu.memory_space<vmem>>, vector<16x128xf32>
    %c0_1 = arith.constant 0 : index
    %c0_2 = arith.constant 0 : index
    %1 = vector.load %arg2[%c0_1, %c0_2] : memref<128x128xf32, #tpu.memory_space<vmem>>, vector<128x128xf32>
    %cst = arith.constant dense<0.000000e+00> : vector<16x128xf32>
    %2 = tpu.matmul %0, %1, %cst {dimension_numbers = #tpu.dot_dimension_numbers<[1], [0], [0], [1], [0, 0, 1, 1], [], []>} : vector<16x128xf32>, vector<128x128xf32>, vector<16x128xf32> -> vector<16x128xf32>
    %c0_3 = arith.constant 0 : index
    %c0_4 = arith.constant 0 : index
    %3 = vector.load %arg3[%c0_3, %c0_4] : memref<1x128xf32, #tpu.memory_space<vmem>>, vector<1x128xf32>
    %4 = vector.broadcast %3 : vector<1x128xf32> to vector<16x128xf32>
    %5 = arith.addf %2, %4 : vector<16x128xf32>
    %cst_5 = arith.constant 0.000000e+00 : f32
    %6 = vector.broadcast %cst_5 : f32 to vector<16x128xf32>
    %7 = arith.maximumf %5, %6 : vector<16x128xf32>
    %c0_6 = arith.constant 0 : index
    %c0_7 = arith.constant 0 : index
    %8 = vector.load %arg4[%c0_6, %c0_7] : memref<128x128xf32, #tpu.memory_space<vmem>>, vector<128x128xf32>
    %cst_8 = arith.constant dense<0.000000e+00> : vector<16x128xf32>
    %9 = tpu.matmul %7, %8, %cst_8 {dimension_numbers = #tpu.dot_dimension_numbers<[1], [0], [0], [1], [0, 0, 1, 1], [], []>} : vector<16x128xf32>, vector<128x128xf32>, vector<16x128xf32> -> vector<16x128xf32>
    %c0_9 = arith.constant 0 : index
    %c0_10 = arith.constant 0 : index
    %10 = vector.load %arg5[%c0_9, %c0_10] : memref<1x128xf32, #tpu.memory_space<vmem>>, vector<1x128xf32>
    %11 = vector.broadcast %10 : vector<1x128xf32> to vector<16x128xf32>
    %12 = arith.addf %9, %11 : vector<16x128xf32>
    %c0_11 = arith.constant 0 : index
    %c0_12 = arith.constant 0 : index
    %13 = vector.load %arg6[%c0_11, %c0_12] : memref<16x128xf32, #tpu.memory_space<vmem>>, vector<16x128xf32>
    tpu.vector_store %arg6[%c0_11, %c0_12], %12 {strides = array<i32>} : memref<16x128xf32, #tpu.memory_space<vmem>>, vector<16x128xf32>,
    return
  }
  func.func @transform_0(%arg0: i32) -> (i32, i32) {
    %c0_i32 = arith.constant 0 : i32
    %c0_i32_0 = arith.constant 0 : i32
    return %arg0, %c0_i32 : i32, i32
  }
  func.func @transform_1(%arg0: i32) -> (i32, i32) {
    %c0_i32 = arith.constant 0 : i32
    %c0_i32_0 = arith.constant 0 : i32
    %c0_i32_1 = arith.constant 0 : i32
    return %c0_i32, %c0_i32_0 : i32, i32
  }
  func.func @transform_2(%arg0: i32) -> (i32, i32) {
    %c0_i32 = arith.constant 0 : i32
    %c0_i32_0 = arith.constant 0 : i32
    %c0_i32_1 = arith.constant 0 : i32
    return %c0_i32, %c0_i32_0 : i32, i32
  }
  func.func @transform_3(%arg0: i32) -> (i32, i32) {
    %c0_i32 = arith.constant 0 : i32
    %c0_i32_0 = arith.constant 0 : i32
    %c0_i32_1 = arith.constant 0 : i32
    return %c0_i32, %c0_i32_0 : i32, i32
  }
  func.func @transform_4(%arg0: i32) -> (i32, i32) {
    %c0_i32 = arith.constant 0 : i32
    %c0_i32_0 = arith.constant 0 : i32
    %c0_i32_1 = arith.constant 0 : i32
    return %c0_i32, %c0_i32_0 : i32, i32
  }
  func.func @transform_5(%arg0: i32) -> (i32, i32) {
    %c0_i32 = arith.constant 0 : i32
    %c0_i32_0 = arith.constant 0 : i32
    return %arg0, %c0_i32 : i32, i32
  }
}

</mosaic_0001>

<bundles_post_ra>
// kernel: positionwise_ffn.1
= control target key start
LH: loop header
LB: loop body
LE: loop exit
PB: predicated region body
PF: predicated region fallthrough
CT: control target
= control target key end

     0   :  { %s542_s1 = inlined_call_operand.vmem [shape: f32[128,128], index: 1, kind: input, shape index: {}]   ;;  %s543_s0 = inlined_call_operand.vmem [shape: f32[16,128], index: 0, kind: input, shape index: {}]   ;;  %s544_s3 = inlined_call_operand.vmem [shape: f32[128,128], index: 3, kind: input, shape index: {}]   ;;  %s545_s2 = inlined_call_operand.vmem [shape: f32[1,128], index: 2, kind: input, shape index: {}]   ;;  %s546_s4 = inlined_call_operand.vmem [shape: f32[1,128], index: 4, kind: input, shape index: {}]   ;;  %s547_s5 = inlined_call_operand.vmem [shape: f32[16,128], index: 5, kind: output, shape index: {}]  }
   0x1   :  { %v22_v0 = vld [vmem:[%s542_s1] sm:$0xff]  ;;  %v23_v1 = vld [vmem:[%s542_s1 + $0x8] sm:$0xff]  ;;  %v24_v2 = vld [vmem:[%s542_s1 + $0x10] sm:$0xff] }
   0x2   :  { %v334_v3 = vpack.c.bf16 %v23_v1, %v22_v0  ;;  %v25_v4 = vld [vmem:[%s542_s1 + $0x18] sm:$0xff]  ;;  %v26_v6 = vld [vmem:[%s542_s1 + $0x20] sm:$0xff]  ;;  %v27_v7 = vld [vmem:[%s542_s1 + $0x28] sm:$0xff] }
   0x3   :  { %v338_v5 = vpack.c.bf16 %v25_v4, %v24_v2  ;;  %v342_v8 = vpack.c.bf16 %v27_v7, %v26_v6  ;;  %v28_v9 = vld [vmem:[%s542_s1 + $0x30] sm:$0xff]  ;;  %v29_v10 = vld [vmem:[%s542_s1 + $0x38] sm:$0xff]  ;;  %v20_v11 = vld [vmem:[%s543_s0] sm:$0xff] }
   0x4   :  { %335 = vmatprep.subr.bf16.mxu0 %v334_v3  ;;  %296 = vmatprep.mubr.f32.mxu0 %v20_v11  ;;  %v122_v12 = vld [vmem:[%s544_s3] sm:$0xff]  ;;  %v123_v13 = vld [vmem:[%s544_s3 + $0x8] sm:$0xff]  ;;  %v124_v14 = vld [vmem:[%s544_s3 + $0x10] sm:$0xff]  ;;  %v346_v20 = vpack.c.bf16 %v29_v10, %v28_v9 }
   0x5   :  { %337 = vmatpush3.bf16.msra.mxu0 %v334_v3  ;;  %v366_v15 = vpack.c.bf16 %v123_v13, %v122_v12  ;;  %v125_v16 = vld [vmem:[%s544_s3 + $0x18] sm:$0xff]  ;;  %v126_v18 = vld [vmem:[%s544_s3 + $0x20] sm:$0xff]  ;;  %v127_v19 = vld [vmem:[%s544_s3 + $0x28] sm:$0xff] }
   0x6   :  { %339 = vmatprep.subr.bf16.mxu0 %v338_v5  ;;  %v370_v17 = vpack.c.bf16 %v125_v16, %v124_v14  ;;  %v30_v21 = vld [vmem:[%s542_s1 + $0x40] sm:$0xff]  ;;  %v31_v22 = vld [vmem:[%s542_s1 + $0x48] sm:$0xff]  ;;  %v374_v23 = vpack.c.bf16 %v127_v19, %v126_v18  ;;  %v128_v24 = vld [vmem:[%s544_s3 + $0x30] sm:$0xff] }
   0x7   :  { %367 = vmatprep.subr.bf16.mxu1 %v366_v15  ;;  %v129_v25 = vld [vmem:[%s544_s3 + $0x38] sm:$0xff]  ;;  %v350_v26 = vpack.c.bf16 %v31_v22, %v30_v21  ;;  %v32_v27 = vld [vmem:[%s542_s1 + $0x50] sm:$0xff]  ;;  %v130_v30 = vld [vmem:[%s544_s3 + $0x40] sm:$0xff] }
   0x8   :  { %369 = vmatpush3.bf16.msra.mxu1 %v366_v15  ;;  %v33_v28 = vld [vmem:[%s542_s1 + $0x58] sm:$0xff]  ;;  %v378_v29 = vpack.c.bf16 %v129_v25, %v128_v24  ;;  %v131_v31 = vld [vmem:[%s544_s3 + $0x48] sm:$0xff]  ;;  %v34_v33 = vld [vmem:[%s542_s1 + $0x60] sm:$0xff] }
   0x9   :  { %341 = vmatpush3.bf16.msra.mxu0 %v338_v5  ;;  %371 = vmatprep.subr.bf16.mxu1 %v370_v17  ;;  %v354_v32 = vpack.c.bf16 %v33_v28, %v32_v27  ;;  %v35_v34 = vld [vmem:[%s542_s1 + $0x68] sm:$0xff]  ;;  %v382_v35 = vpack.c.bf16 %v131_v31, %v130_v30  ;;  %v132_v36 = vld [vmem:[%s544_s3 + $0x50] sm:$0xff]  ;;  %v133_v37 = vld [vmem:[%s544_s3 + $0x58] sm:$0xff] }
   0xa   :  { %343 = vmatprep.subr.bf16.mxu0 %v342_v8  ;;  %v358_v38 = vpack.c.bf16 %v35_v34, %v34_v33  ;;  %v36_v39 = vld [vmem:[%s542_s1 + $0x70] sm:$0xff]  ;;  %v37_v40 = vld [vmem:[%s542_s1 + $0x78] sm:$0xff]  ;;  %v386_v41 = vpack.c.bf16 %v133_v37, %v132_v36  ;;  %v134_v42 = vld [vmem:[%s544_s3 + $0x60] sm:$0xff] }
   0xb   :  { %v135_v43 = vld [vmem:[%s544_s3 + $0x68] sm:$0xff]  ;;  %v362_v44 = vpack.c.bf16 %v37_v40, %v36_v39  ;;  %v136_v47 = vld [vmem:[%s544_s3 + $0x70] sm:$0xff]  ;;  %v137_v48 = vld [vmem:[%s544_s3 + $0x78] sm:$0xff] }
   0xc   :  { %373 = vmatpush3.bf16.msra.mxu1 %v370_v17  ;;  %v390_v45 = vpack.c.bf16 %v135_v43, %v134_v42  ;;  %v21_v46 = vld [vmem:[%s543_s0 + $0x8] sm:$0xff]  ;;  %v394_v49 = vpack.c.bf16 %v137_v48, %v136_v47  ;;  %v226_v50 = vld [vmem:[%s545_s2] ss:$0 sm:$0xff] }
   0xd   :  { %345 = vmatpush3.bf16.msra.mxu0 %v342_v8  ;;  %375 = vmatprep.subr.bf16.mxu1 %v374_v23  ;;  %v227_v57 = vld [vmem:[%s546_s4] ss:$0 sm:$0xff] }
   0xe   :  { %347 = vmatprep.subr.bf16.mxu0 %v346_v20 }
  0x10   :  { %377 = vmatpush3.bf16.msra.mxu1 %v374_v23 }
  0x11   :  { %349 = vmatpush3.bf16.msra.mxu0 %v346_v20  ;;  %379 = vmatprep.subr.bf16.mxu1 %v378_v29 }
  0x12   :  { %351 = vmatprep.subr.bf16.mxu0 %v350_v26 }
  0x14   :  { %381 = vmatpush3.bf16.msra.mxu1 %v378_v29 }
  0x15   :  { %353 = vmatpush3.bf16.msra.mxu0 %v350_v26  ;;  %383 = vmatprep.subr.bf16.mxu1 %v382_v35 }
  0x16   :  { %355 = vmatprep.subr.bf16.mxu0 %v354_v32 }
  0x18   :  { %385 = vmatpush3.bf16.msra.mxu1 %v382_v35 }
  0x19   :  { %357 = vmatpush3.bf16.msra.mxu0 %v354_v32  ;;  %387 = vmatprep.subr.bf16.mxu1 %v386_v41 }
  0x1a   :  { %359 = vmatprep.subr.bf16.mxu0 %v358_v38 }
  0x1c   :  { %389 = vmatpush3.bf16.msra.mxu1 %v386_v41 }
  0x1d   :  { %361 = vmatpush3.bf16.msra.mxu0 %v358_v38  ;;  %391 = vmatprep.subr.bf16.mxu1 %v390_v45 }
  0x1e   :  { %363 = vmatprep.subr.bf16.mxu0 %v362_v44 }
  0x20   :  { %393 = vmatpush3.bf16.msra.mxu1 %v390_v45 }
  0x21   :  { %365 = vmatpush3.bf16.msra.mxu0 %v362_v44  ;;  %395 = vmatprep.subr.bf16.mxu1 %v394_v49 }
  0x24   :  { %297 = vmatmul.mubr.f32.vlgmr.msra.gmra.mrb[0].mxu0 %v21_v46  ;;  %397 = vmatpush3.bf16.msra.mxu1 %v394_v49 }
  0xf7   :  { %v298_v51 = vpop.f32.mrb[0].mxu0 }
  0xf8   :  { %v117_v52 = vadd.f32 %v298_v51, %v226_v50  ;;  %v111_v53 = vpop.f32.mrb[1].mxu0 }
  0xf9   :  { %v112_v54 = vadd.f32 %v226_v50, %v111_v53 }
  0xfa   :  { %v121_v56 = vmax.f32 %v117_v52, 0.0 }
  0xfb   :  { %v120_v55 = vmax.f32 %v112_v54, 0.0 }
  0xfd   :  { %331 = vmatprep.mubr.f32.mxu1 %v120_v55 }
  0xfe   :  { %332 = vmatmul.mubr.f32.vlgmr.msra.gmra.mrb[0].mxu1 %v121_v56 }
 0x1d1   :  { %v333_v58 = vpop.f32.mrb[0].mxu1 }
 0x1d2   :  { %v217_v59 = vadd.f32 %v333_v58, %v227_v57  ;;  %v211_v60 = vpop.f32.mrb[1].mxu1 }
 0x1d3   :  { %v212_v61 = vadd.f32 %v227_v57, %v211_v60 }
 0x1d4   :  { %221 = vst [vmem:[%s547_s5 + $0x8] sm:$0xff] %v217_v59 }
 0x1d5   :  { %220 = vst [vmem:[%s547_s5] sm:$0xff] %v212_v61 }

</bundles_post_ra>
